<compile_context>
chip_gen: v7x
topology: tpu7x:2x2x1
jax: 0.10.0
libtpu: 0.0.40
codegen_flags: <defaults>
</compile_context>

<pallas_src>
import jax
import jax.numpy as jnp
from jax.experimental import pallas as pl
from jax.experimental.pallas import tpu as pltpu

IN_FEATURES = 2
OUT_FEATURES = 3
PAD_OUT = 128          # lane-dense padded output width
MAX_BATCH_TILE = 512   # rows per grid step; double-buffered tiles stay well
                       # under v7x's 32 MiB scoped / 64 MiB physical VMEM


def _linear_kernel(x_ref, w_ref, b_ref, o_ref):
    # x_ref: (tile_b, IN_FEATURES)   -- K stays at its true width (2)
    # w_ref: (IN_FEATURES, PAD_OUT)  -- (in, out) layout, zero-padded out dim
    # b_ref: (1, PAD_OUT)
    # o_ref: (tile_b, PAD_OUT)       -- lane-dense output tile (unmasked vst)
    x = x_ref[...]
    w = w_ref[...]
    b = b_ref[...]
    # K == 2 contraction as two broadcast FMAs on the VPU (skip the MXU).
    out = x[:, 0:1] * w[0:1, :] + x[:, 1:2] * w[1:2, :] + b
    o_ref[...] = out.astype(o_ref.dtype)


def prepare_params(weight, bias):
    """Pad the PyTorch-layout (out, in) weight and (out,) bias once, outside the hot path."""
    w_p = (
        jnp.zeros((IN_FEATURES, PAD_OUT), jnp.float32)
        .at[:, :OUT_FEATURES]
        .set(weight.T)                       # kernel uses (in, out) layout
    )
    b_p = jnp.zeros((1, PAD_OUT), jnp.float32).at[0, :OUT_FEATURES].set(bias)
    return w_p, b_p


@jax.jit
def dummy_model_forward(x, w_p, b_p):
    """x: (B, 2) float32; w_p: (2, 128); b_p: (1, 128) — pre-padded params."""
    batch = x.shape[0]
    b_pad8 = ((batch + 7) // 8) * 8
    tile_b = min(MAX_BATCH_TILE, b_pad8)
    b_pad = ((batch + tile_b - 1) // tile_b) * tile_b

    # Pad only the (cheap) batch dim; feature width keeps its true value (2).
    x_p = jnp.pad(x, ((0, b_pad - batch), (0, 0)))

    out_p = pl.pallas_call(
        _linear_kernel,
        out_shape=jax.ShapeDtypeStruct((b_pad, PAD_OUT), jnp.float32),
        grid=(b_pad // tile_b,),
        in_specs=[
            pl.BlockSpec((tile_b, IN_FEATURES), lambda i: (i, 0)),
            pl.BlockSpec((IN_FEATURES, PAD_OUT), lambda i: (0, 0)),
            pl.BlockSpec((1, PAD_OUT), lambda i: (0, 0)),
        ],
        out_specs=pl.BlockSpec((tile_b, PAD_OUT), lambda i: (i, 0)),
        compiler_params=pltpu.CompilerParams(
            dimension_semantics=("parallel",),
        ),
    )(x_p, w_p, b_p)

    return {"output": out_p[:batch, :OUT_FEATURES]}


if __name__ == "__main__":
    key = jax.random.PRNGKey(0)
    k_x, k_w, k_b = jax.random.split(key, 3)

    # Deterministic parameter init mimicking nn.Linear(2, 3):
    # weight (out, in) = (3, 2), bias (3,), uniform in [-1/sqrt(in), 1/sqrt(in)].
    bound = 1.0 / (IN_FEATURES ** 0.5)
    weight = jax.random.uniform(
        k_w, (OUT_FEATURES, IN_FEATURES), jnp.float32, minval=-bound, maxval=bound
    )
    bias = jax.random.uniform(
        k_b, (OUT_FEATURES,), jnp.float32, minval=-bound, maxval=bound
    )

    # One-time parameter padding (hoisted out of the forward path).
    w_p, b_p = prepare_params(weight, bias)

    # Example input: batch=8, features=2 (what Linear(2, 3) implies).
    x = jax.random.normal(k_x, (8, IN_FEATURES), jnp.float32)

    out = dummy_model_forward(x, w_p, b_p)
    jax.block_until_ready(out["output"])

    # Correctness check against plain-JAX reference.
    ref = x @ weight.T + bias
    assert out["output"].shape == (8, OUT_FEATURES)
    assert jnp.allclose(out["output"], ref, atol=1e-5), "mismatch vs reference"

    print("KERNEL_OK")
</pallas_src>

<mosaic_0001>
module attributes {stable_mosaic.version = 11 : i64} {
  func.func @_linear_kernel(%arg0: i32, %arg1: memref<8x2xf32, #tpu.memory_space<vmem>>, %arg2: memref<2x128xf32, #tpu.memory_space<vmem>>, %arg3: memref<1x128xf32, #tpu.memory_space<vmem>>, %arg4: memref<8x128xf32, #tpu.memory_space<vmem>>) attributes {dimension_semantics = [#tpu.dimension_semantics<parallel>], iteration_bounds = array<i64: 1>, scalar_prefetch = 0 : i64, scratch_operands = 0 : i64, tpu.core_type = #tpu.core_type<tc>, window_params = [{transform_indices = @transform_0, window_bounds = array<i64: 8, 2>}, {pipeline_mode = #tpu.pipeline_mode<synchronous>, transform_indices = @transform_1, window_bounds = array<i64: 2, 128>}, {pipeline_mode = #tpu.pipeline_mode<synchronous>, transform_indices = @transform_2, window_bounds = array<i64: 1, 128>}, {transform_indices = @transform_3, window_bounds = array<i64: 8, 128>}]} {
    %c0 = arith.constant 0 : index
    %c0_0 = arith.constant 0 : index
    %0 = vector.load %arg1[%c0, %c0_0] : memref<8x2xf32, #tpu.memory_space<vmem>>, vector<8x2xf32>
    %c0_1 = arith.constant 0 : index
    %c0_2 = arith.constant 0 : index
    %1 = vector.load %arg2[%c0_1, %c0_2] : memref<2x128xf32, #tpu.memory_space<vmem>>, vector<2x128xf32>
    %c0_3 = arith.constant 0 : index
    %c0_4 = arith.constant 0 : index
    %2 = vector.load %arg3[%c0_3, %c0_4] : memref<1x128xf32, #tpu.memory_space<vmem>>, vector<1x128xf32>
    %3 = vector.extract_strided_slice %0 {offsets = [0, 0], sizes = [8, 1], strides = [1, 1]} : vector<8x2xf32> to vector<8x1xf32>
    %4 = vector.extract_strided_slice %1 {offsets = [0, 0], sizes = [1, 128], strides = [1, 1]} : vector<2x128xf32> to vector<1x128xf32>
    %5 = vector.broadcast %3 : vector<8x1xf32> to vector<8x128xf32>
    %6 = vector.broadcast %4 : vector<1x128xf32> to vector<8x128xf32>
    %7 = arith.mulf %5, %6 : vector<8x128xf32>
    %8 = vector.extract_strided_slice %0 {offsets = [0, 1], sizes = [8, 1], strides = [1, 1]} : vector<8x2xf32> to vector<8x1xf32>
    %9 = vector.extract_strided_slice %1 {offsets = [1, 0], sizes = [1, 128], strides = [1, 1]} : vector<2x128xf32> to vector<1x128xf32>
    %10 = vector.broadcast %8 : vector<8x1xf32> to vector<8x128xf32>
    %11 = vector.broadcast %9 : vector<1x128xf32> to vector<8x128xf32>
    %12 = arith.mulf %10, %11 : vector<8x128xf32>
    %13 = arith.addf %7, %12 : vector<8x128xf32>
    %14 = vector.broadcast %2 : vector<1x128xf32> to vector<8x128xf32>
    %15 = arith.addf %13, %14 : vector<8x128xf32>
    %c0_5 = arith.constant 0 : index
    %c0_6 = arith.constant 0 : index
    %16 = vector.load %arg4[%c0_5, %c0_6] : memref<8x128xf32, #tpu.memory_space<vmem>>, vector<8x128xf32>
    tpu.vector_store %arg4[%c0_5, %c0_6], %15 {strides = array<i32>} : memref<8x128xf32, #tpu.memory_space<vmem>>, vector<8x128xf32>,
    return
  }
  func.func @transform_0(%arg0: i32) -> (i32, i32) {
    %c0_i32 = arith.constant 0 : i32
    %c0_i32_0 = arith.constant 0 : i32
    return %arg0, %c0_i32 : i32, i32
  }
  func.func @transform_1(%arg0: i32) -> (i32, i32) {
    %c0_i32 = arith.constant 0 : i32
    %c0_i32_0 = arith.constant 0 : i32
    %c0_i32_1 = arith.constant 0 : i32
    return %c0_i32, %c0_i32_0 : i32, i32
  }
  func.func @transform_2(%arg0: i32) -> (i32, i32) {
    %c0_i32 = arith.constant 0 : i32
    %c0_i32_0 = arith.constant 0 : i32
    %c0_i32_1 = arith.constant 0 : i32
    return %c0_i32, %c0_i32_0 : i32, i32
  }
  func.func @transform_3(%arg0: i32) -> (i32, i32) {
    %c0_i32 = arith.constant 0 : i32
    %c0_i32_0 = arith.constant 0 : i32
    return %arg0, %c0_i32 : i32, i32
  }
}

</mosaic_0001>

<bundles_post_ra>
// kernel: dummy_model_forward.1
= control target key start
LH: loop header
LB: loop body
LE: loop exit
PB: predicated region body
PF: predicated region fallthrough
CT: control target
= control target key end

     0   :  { %v54_v0 = vmov 0   ;;  %v55_v2 = vmov 1   ;;  %v22_v3 = vlaneseq  ;;  %s88_s0 = inlined_call_operand.vmem [shape: f32[8,2], index: 0, kind: input, shape index: {}]   ;;  %s89_s1 = inlined_call_operand.vmem [shape: f32[2,128], index: 1, kind: input, shape index: {}]   ;;  %s90_s2 = inlined_call_operand.vmem [shape: f32[1,128], index: 2, kind: input, shape index: {}]   ;;  %s91_s3 = inlined_call_operand.vmem [shape: f32[8,128], index: 3, kind: output, shape index: {}]  }
   0x1   :  { %52 = vset.pattern.permute.xlu0 %v54_v0  ;;  %v14_v1 = vld [vmem:[%s88_s0] sm:$0xff] }
   0x2   :  { %19 = vperm.xlu0 %52, %v14_v1   ;;  %v23_v4 = vshrl.u32 %v22_v3, 7  ;;  %v15_v7 = vld [vmem:[%s89_s1] sm:$0x3] }
   0x3   :  { %v49_v14 = vld [vmem:[%s90_s2] ss:$0 sm:$0xff] }
   0x4   :  { %v24_v5 = vsub.s32 0, %v23_v4  ;;  %v33_v6 = vsub.s32 1, %v23_v4 }
   0x6   :  { %53 = vset.pattern.permute.xlu0 %v55_v2  ;;  %v25_v9 = vrot.slane %v15_v7, %v24_v5  ;;  %v34_v10 = vrot.slane %v15_v7, %v33_v6 }
   0x7   :  { %28 = vperm.xlu0 %53, %v14_v1  }
  0x81   :  { %v20_v8 = vpop.permute.xlu0 %19 }
  0x82   :  { %v26_v12 = vmul.f32 %v25_v9, %v20_v8 }
  0x86   :  { %v29_v11 = vpop.permute.xlu0 %28 }
  0x87   :  { %v35_v13 = vmul.f32 %v34_v10, %v29_v11 }
  0x89   :  { %v36_v15 = vadd.f32 %v35_v13, %v26_v12 }
  0x8b   :  { %v43_v16 = vadd.f32 %v49_v14, %v36_v15 }
  0x8d   :  { %44 = vst [vmem:[%s91_s3] sm:$0xff] %v43_v16 }

</bundles_post_ra>
